<compile_context>
chip_gen: v7x
topology: tpu7x:2x2x1
jax: 0.10.0
libtpu: 0.0.40
codegen_flags: <defaults>
</compile_context>

<pallas_src>
import jax
import jax.numpy as jnp
from jax.experimental import pallas as pl
from jax.experimental.pallas import tpu as pltpu

HIDDEN = 512


def _round_up(n, m):
    return ((n + m - 1) // m) * m


def value_net_kernel(x_ref, w1_ref, b1_ref, w2_ref, b2_ref, w3_ref, b3_ref, o_ref):
    # Layer 1: bf16 MXU matmul, f32 accumulation; bias + SiLU in f32.
    h = jnp.dot(x_ref[...], w1_ref[...], preferred_element_type=jnp.float32)
    h = h + b1_ref[...]
    h = h * jax.nn.sigmoid(h)           # SiLU

    # Layer 2: bf16 MXU matmul, f32 accumulation; bias + SiLU in f32.
    h = jnp.dot(h.astype(jnp.bfloat16), w2_ref[...],
                preferred_element_type=jnp.float32)
    h = h + b2_ref[...]
    h = h * jax.nn.sigmoid(h)           # SiLU

    # Layer 3 (out_features=1): keep it off the MXU -> VPU multiply + lane reduce.
    out = jnp.sum(h * w3_ref[...], axis=-1, keepdims=True) + b3_ref[...]
    o_ref[...] = out.astype(o_ref.dtype)


def value_network_forward(x, params, tile_b=512):
    """x: (B, D_in) float32. params: w1(D,512) bf16, b1(1,512) f32, w2(512,512) bf16,
    b2(1,512) f32, w3(1,512) f32, b3(1,1) f32. Returns (B, 1) float32."""
    B, D = x.shape
    H = params["w1"].shape[1]

    tile_b = min(tile_b, _round_up(B, 8))       # small batches: single block
    b_pad = _round_up(B, tile_b)

    xb = x.astype(jnp.bfloat16)                  # halve x DMA traffic
    if b_pad != B:
        xb = jnp.pad(xb, ((0, b_pad - B), (0, 0)))

    grid = (b_pad // tile_b,)

    flops = 2 * b_pad * (D * H + H * H + H)
    transcendentals = 2 * b_pad * H              # two SiLU sigmoids per row
    bytes_accessed = (b_pad * D * 2              # x (bf16)
                      + (D * H + H * H) * 2      # w1, w2 (bf16)
                      + (3 * H + 1) * 4          # b1, b2, w3, b3 (f32)
                      + b_pad * 4)               # output (f32)

    out = pl.pallas_call(
        value_net_kernel,
        out_shape=jax.ShapeDtypeStruct((b_pad, 1), jnp.float32),
        grid=grid,
        in_specs=[
            pl.BlockSpec((tile_b, D), lambda i: (i, 0)),   # x: streamed per step
            pl.BlockSpec((D, H), lambda i: (0, 0)),        # w1: resident
            pl.BlockSpec((1, H), lambda i: (0, 0)),        # b1: resident
            pl.BlockSpec((H, H), lambda i: (0, 0)),        # w2: resident
            pl.BlockSpec((1, H), lambda i: (0, 0)),        # b2: resident
            pl.BlockSpec((1, H), lambda i: (0, 0)),        # w3 row: resident
            pl.BlockSpec((1, 1), lambda i: (0, 0)),        # b3: resident
        ],
        out_specs=pl.BlockSpec((tile_b, 1), lambda i: (i, 0)),
        compiler_params=pltpu.CompilerParams(
            dimension_semantics=("parallel",)),            # megacore on v7x
        cost_estimate=pl.CostEstimate(
            flops=flops,
            transcendentals=transcendentals,
            bytes_accessed=bytes_accessed),
    )(
        xb,
        params["w1"], params["b1"],
        params["w2"], params["b2"],
        params["w3"], params["b3"],
    )
    return out[:B]


def init_params(key, input_size, hidden=HIDDEN):
    """PyTorch nn.Linear-style init (uniform +/- 1/sqrt(fan_in)).
    w1/w2 are stored transposed (fan_in, fan_out) in bf16 for the MXU;
    w3 is a (1, hidden) f32 row (PyTorch layout) for the VPU reduce."""
    ks = jax.random.split(key, 6)

    def lin(kw, kb, fan_in, fan_out, w_dtype):
        bound = 1.0 / jnp.sqrt(fan_in)
        w = jax.random.uniform(kw, (fan_in, fan_out), jnp.float32, -bound, bound)
        b = jax.random.uniform(kb, (1, fan_out), jnp.float32, -bound, bound)
        return w.astype(w_dtype), b

    w1, b1 = lin(ks[0], ks[1], input_size, hidden, jnp.bfloat16)
    w2, b2 = lin(ks[2], ks[3], hidden, hidden, jnp.bfloat16)
    w3t, b3 = lin(ks[4], ks[5], hidden, 1, jnp.float32)
    w3 = w3t.T                                   # (1, hidden) row, f32
    b3 = b3.reshape(1, 1)
    return {"w1": w1, "b1": b1, "w2": w2, "b2": b2, "w3": w3, "b3": b3}


def reference_forward(x, p):
    """Pure-JAX reference mirroring the kernel's numerics (bf16 matmul inputs,
    f32 accumulation, f32 SiLU)."""
    h = jnp.dot(x.astype(jnp.bfloat16), p["w1"],
                preferred_element_type=jnp.float32) + p["b1"]
    h = h * jax.nn.sigmoid(h)
    h = jnp.dot(h.astype(jnp.bfloat16), p["w2"],
                preferred_element_type=jnp.float32) + p["b2"]
    h = h * jax.nn.sigmoid(h)
    return jnp.sum(h * p["w3"], axis=-1, keepdims=True) + p["b3"]


if __name__ == "__main__":
    key = jax.random.PRNGKey(0)
    k_x, k_p = jax.random.split(key)

    batch = 20           # non-multiple of tile -> exercises padding + multi-step grid
    input_size = 32
    tile_b = 8           # small tile for the toy test; default is 512 for real batches

    x = jax.random.normal(k_x, (batch, input_size), jnp.float32)
    params = init_params(k_p, input_size)

    out = value_network_forward(x, params, tile_b=tile_b)
    out = jax.block_until_ready(out)

    ref = reference_forward(x, params)
    assert out.shape == (batch, 1), out.shape
    assert jnp.allclose(out, ref, atol=1e-3, rtol=1e-3), (out, ref)

    print("KERNEL_OK")
</pallas_src>

<mosaic_0001>
module attributes {stable_mosaic.version = 11 : i64} {
  func.func @value_net_kernel(%arg0: i32, %arg1: memref<8x32xbf16, #tpu.memory_space<vmem>>, %arg2: memref<32x512xbf16, #tpu.memory_space<vmem>>, %arg3: memref<1x512xf32, #tpu.memory_space<vmem>>, %arg4: memref<512x512xbf16, #tpu.memory_space<vmem>>, %arg5: memref<1x512xf32, #tpu.memory_space<vmem>>, %arg6: memref<1x512xf32, #tpu.memory_space<vmem>>, %arg7: memref<1x1xf32, #tpu.memory_space<vmem>>, %arg8: memref<8x1xf32, #tpu.memory_space<vmem>>) attributes {dimension_semantics = [#tpu.dimension_semantics<parallel>], iteration_bounds = array<i64: 3>, scalar_prefetch = 0 : i64, scratch_operands = 0 : i64, tpu.core_type = #tpu.core_type<tc>, window_params = [{transform_indices = @transform_0, window_bounds = array<i64: 8, 32>}, {pipeline_mode = #tpu.pipeline_mode<synchronous>, transform_indices = @transform_1, window_bounds = array<i64: 32, 512>}, {pipeline_mode = #tpu.pipeline_mode<synchronous>, transform_indices = @transform_2, window_bounds = array<i64: 1, 512>}, {pipeline_mode = #tpu.pipeline_mode<synchronous>, transform_indices = @transform_3, window_bounds = array<i64: 512, 512>}, {pipeline_mode = #tpu.pipeline_mode<synchronous>, transform_indices = @transform_4, window_bounds = array<i64: 1, 512>}, {pipeline_mode = #tpu.pipeline_mode<synchronous>, transform_indices = @transform_5, window_bounds = array<i64: 1, 512>}, {pipeline_mode = #tpu.pipeline_mode<synchronous>, transform_indices = @transform_6, window_bounds = array<i64: 1, 1>}, {transform_indices = @transform_7, window_bounds = array<i64: 8, 1>}]} {
    %c0 = arith.constant 0 : index
    %c0_0 = arith.constant 0 : index
    %0 = vector.load %arg1[%c0, %c0_0] : memref<8x32xbf16, #tpu.memory_space<vmem>>, vector<8x32xbf16>
    %c0_1 = arith.constant 0 : index
    %c0_2 = arith.constant 0 : index
    %1 = vector.load %arg2[%c0_1, %c0_2] : memref<32x512xbf16, #tpu.memory_space<vmem>>, vector<32x512xbf16>
    %cst = arith.constant dense<0.000000e+00> : vector<8x512xf32>
    %2 = tpu.matmul %0, %1, %cst {dimension_numbers = #tpu.dot_dimension_numbers<[1], [0], [0], [1], [0, 0, 1, 1], [], []>} : vector<8x32xbf16>, vector<32x512xbf16>, vector<8x512xf32> -> vector<8x512xf32>
    %c0_3 = arith.constant 0 : index
    %c0_4 = arith.constant 0 : index
    %3 = vector.load %arg3[%c0_3, %c0_4] : memref<1x512xf32, #tpu.memory_space<vmem>>, vector<1x512xf32>
    %4 = vector.broadcast %3 : vector<1x512xf32> to vector<8x512xf32>
    %5 = arith.addf %2, %4 : vector<8x512xf32>
    %6 = arith.negf %5 : vector<8x512xf32>
    %7 = math.exp %6 : vector<8x512xf32>
    %cst_5 = arith.constant 1.000000e+00 : f32
    %8 = vector.broadcast %cst_5 : f32 to vector<8x512xf32>
    %9 = arith.addf %8, %7 : vector<8x512xf32>
    %10 = arith.divf %8, %9 : vector<8x512xf32>
    %11 = arith.mulf %5, %10 : vector<8x512xf32>
    %12 = arith.truncf %11 : vector<8x512xf32> to vector<8x512xbf16>
    %c0_6 = arith.constant 0 : index
    %c0_7 = arith.constant 0 : index
    %13 = vector.load %arg4[%c0_6, %c0_7] : memref<512x512xbf16, #tpu.memory_space<vmem>>, vector<512x512xbf16>
    %cst_8 = arith.constant dense<0.000000e+00> : vector<8x512xf32>
    %14 = tpu.matmul %12, %13, %cst_8 {dimension_numbers = #tpu.dot_dimension_numbers<[1], [0], [0], [1], [0, 0, 1, 1], [], []>} : vector<8x512xbf16>, vector<512x512xbf16>, vector<8x512xf32> -> vector<8x512xf32>
    %c0_9 = arith.constant 0 : index
    %c0_10 = arith.constant 0 : index
    %15 = vector.load %arg5[%c0_9, %c0_10] : memref<1x512xf32, #tpu.memory_space<vmem>>, vector<1x512xf32>
    %16 = vector.broadcast %15 : vector<1x512xf32> to vector<8x512xf32>
    %17 = arith.addf %14, %16 : vector<8x512xf32>
    %18 = arith.negf %17 : vector<8x512xf32>
    %19 = math.exp %18 : vector<8x512xf32>
    %cst_11 = arith.constant 1.000000e+00 : f32
    %20 = vector.broadcast %cst_11 : f32 to vector<8x512xf32>
    %21 = arith.addf %20, %19 : vector<8x512xf32>
    %22 = arith.divf %20, %21 : vector<8x512xf32>
    %23 = arith.mulf %17, %22 : vector<8x512xf32>
    %c0_12 = arith.constant 0 : index
    %c0_13 = arith.constant 0 : index
    %24 = vector.load %arg6[%c0_12, %c0_13] : memref<1x512xf32, #tpu.memory_space<vmem>>, vector<1x512xf32>
    %25 = vector.broadcast %24 : vector<1x512xf32> to vector<8x512xf32>
    %26 = arith.mulf %23, %25 : vector<8x512xf32>
    %cst_14 = arith.constant dense<0.000000e+00> : vector<8xf32>
    %27 = vector.multi_reduction <add>, %26, %cst_14 [1] : vector<8x512xf32> to vector<8xf32>
    %28 = vector.shape_cast %27 : vector<8xf32> to vector<8x1xf32>
    %c0_15 = arith.constant 0 : index
    %c0_16 = arith.constant 0 : index
    %29 = vector.load %arg7[%c0_15, %c0_16] : memref<1x1xf32, #tpu.memory_space<vmem>>, vector<1x1xf32>
    %30 = vector.broadcast %29 : vector<1x1xf32> to vector<8x1xf32>
    %31 = arith.addf %28, %30 : vector<8x1xf32>
    %c0_17 = arith.constant 0 : index
    %c0_18 = arith.constant 0 : index
    %32 = vector.load %arg8[%c0_17, %c0_18] : memref<8x1xf32, #tpu.memory_space<vmem>>, vector<8x1xf32>
    tpu.vector_store %arg8[%c0_17, %c0_18], %31 {strides = array<i32>} : memref<8x1xf32, #tpu.memory_space<vmem>>, vector<8x1xf32>,
    return
  }
  func.func @transform_0(%arg0: i32) -> (i32, i32) {
    %c0_i32 = arith.constant 0 : i32
    %c0_i32_0 = arith.constant 0 : i32
    return %arg0, %c0_i32 : i32, i32
  }
  func.func @transform_1(%arg0: i32) -> (i32, i32) {
    %c0_i32 = arith.constant 0 : i32
    %c0_i32_0 = arith.constant 0 : i32
    %c0_i32_1 = arith.constant 0 : i32
    return %c0_i32, %c0_i32_0 : i32, i32
  }
  func.func @transform_2(%arg0: i32) -> (i32, i32) {
    %c0_i32 = arith.constant 0 : i32
    %c0_i32_0 = arith.constant 0 : i32
    %c0_i32_1 = arith.constant 0 : i32
    return %c0_i32, %c0_i32_0 : i32, i32
  }
  func.func @transform_3(%arg0: i32) -> (i32, i32) {
    %c0_i32 = arith.constant 0 : i32
    %c0_i32_0 = arith.constant 0 : i32
    %c0_i32_1 = arith.constant 0 : i32
    return %c0_i32, %c0_i32_0 : i32, i32
  }
  func.func @transform_4(%arg0: i32) -> (i32, i32) {
    %c0_i32 = arith.constant 0 : i32
    %c0_i32_0 = arith.constant 0 : i32
    %c0_i32_1 = arith.constant 0 : i32
    return %c0_i32, %c0_i32_0 : i32, i32
  }
  func.func @transform_5(%arg0: i32) -> (i32, i32) {
    %c0_i32 = arith.constant 0 : i32
    %c0_i32_0 = arith.constant 0 : i32
    %c0_i32_1 = arith.constant 0 : i32
    return %c0_i32, %c0_i32_0 : i32, i32
  }
  func.func @transform_6(%arg0: i32) -> (i32, i32) {
    %c0_i32 = arith.constant 0 : i32
    %c0_i32_0 = arith.constant 0 : i32
    %c0_i32_1 = arith.constant 0 : i32
    return %c0_i32, %c0_i32_0 : i32, i32
  }
  func.func @transform_7(%arg0: i32) -> (i32, i32) {
    %c0_i32 = arith.constant 0 : i32
    %c0_i32_0 = arith.constant 0 : i32
    return %arg0, %c0_i32 : i32, i32
  }
}

</mosaic_0001>

<bundles_post_ra>
// kernel: tpu_custom_call.1
= control target key start
LH: loop header
LB: loop body
LE: loop exit
PB: predicated region body
PF: predicated region fallthrough
CT: control target
= control target key end

     0   :  { %s2489_s0 = inlined_call_operand.hbm [shape: bf16[24,32], index: 0, kind: input, shape index: {}]   ;;  %s2490_s1 = inlined_call_operand.hbm [shape: bf16[32,512], index: 1, kind: input, shape index: {}]   ;;  %s2491_s2 = inlined_call_operand.vmem [shape: f32[1,512], index: 2, kind: input, shape index: {}]   ;;  %s2492_s3 = inlined_call_operand.hbm [shape: bf16[512,512], index: 3, kind: input, shape index: {}]   ;;  %s2493_s4 = inlined_call_operand.vmem [shape: f32[1,512], index: 4, kind: input, shape index: {}]   ;;  %s2494_s5 = inlined_call_operand.vmem [shape: f32[1,512], index: 5, kind: input, shape index: {}]   ;;  %s2495_s6 = inlined_call_operand.<no memory space> [shape: f32[1,1], index: 6, kind: input, shape index: {}]   ;;  %s2496_s7 = inlined_call_operand.vmem [shape: f32[24,1], index: 7, kind: output, shape index: {}]  }
   0x1   :  { %v12_v0 = vstv %s2495_s6 }
   0x2   :  { %13 = vst [vmem:[#allocation2] sm:$0x1] %v12_v0 }
   0x3   :  { %14 = vsyncpa [#allocation4], 0 }
   0x4   :  { %16 = vsyncpa [#allocation4 + $0x1], 0 }
   0x5   :  { %17 = vsyncpa [#allocation6], 0  ;;  %s2269_s26 = smov 0   ;;  %s2271_s27 = smov 0  }
   0x6   :  { %s2273_s28 = smov 0   ;;  %s2275_s29 = smov 0  }
   0x7 LB: > { %s2288_s6 = sadd.s32 4294967295, %s2218_s29   ;;  %p43_p0 = scmp.ne.s32.totalorder %s2210_s27, %s2206_s26  ;;  %s2218_s29 = sphi %s2275_s29, %s2511_s29   ;;  %s2214_s28 = sphi %s2273_s28, %s2510_s28   ;;  %s2210_s27 = sphi %s2271_s27, %s2509_s27   ;;  %s2206_s26 = sphi %s2269_s26, %s2508_s26  }
   0x8   : > { %p2497_p1 = scmp.eq.s32.totalorder %s2288_s6, 0  ;;  %p1623_p2 = scmp.ge.s32.totalorder %s2218_s29, 1 }
   0x9   : > { %p206_p3 = scmp.lt.s32.totalorder %s2218_s29, 4  ;;  %s2220_s9 = smov [#allocation5]  }
   0xa   : > { %p2296_p4 = por %p2497_p1, %p43_p0  ;;  %s218_s10 = sshll.u32 %s2220_s9, 4  ;;  %s219_s10 = int_to_ptr.vmem [resolvable:$true] %s218_s10 }
   0xb   : > { %p2300_p5 = pnand %p1623_p2, %p206_p3  ;;  %s2221_s12 = smov [#allocation7]  }
   0xc   : > { %s2500_s30 = scalar_select %p2296_p4, 1, 0 }
   0xd   : > { %s2501_s8 = scalar_select %p2300_p5, 1, 0 }
   0xe   : > { %p1805_p6 = pneg %p2300_p5  ;;  %s234_s13 = sshll.u32 %s2221_s12, 4  ;;  %s2312_s13 = int_to_ptr.vmem [resolvable:$true] %s234_s13 }
   0xf   : > { %s2094_s16 = scalar_lea.hbm %s2490_s1, 1024 }
  0x10   : > { %p2308_p7 = pnand %p1805_p6, %p2497_p1  ;;  %p2095_p8 = scmp.ne.s32.totalorder %s2490_s1, %s2094_s16 }
  0x11   : > { %p2101_p12 = scmp.lt.u32.totalorder %s2094_s16, %s2490_s1 }
  0x12   : > { %p2096_p9 = pneg %p2308_p7 }
  0x14   : > { %p2097_p10 = pnand %p2096_p9, %p2095_p8 }
  0x16   : > { %p2098_p11 = pneg %p2097_p10 }
  0x18   : > { %p2103_p13 = pnand %p2101_p12, %p2098_p11 }
  0x1a   : > { %2106 = shalt.err (!%p2103_p13)
}
  0x1b   : > { %s2107_s21 = scalar_lea.vmem %s219_s10, 1024  ;;  %p2115_p6 = scmp.lt.s32.totalorder %s219_s10, %s219_s10 }
  0x1c   : > { %p2108_p0 = scmp.ne.s32.totalorder %s219_s10, %s2107_s21  ;;  %p2116_p1 = scmp.lt.s32.totalorder %s2107_s21, %s2107_s21 }
  0x1e   : > { %p2110_p2 = pnand %p2108_p0, %p2096_p9  ;;  %p2117_p4 = por %p2116_p1, %p2115_p6 }
  0x20   : > { %p2111_p3 = pneg %p2110_p2 }
  0x22   : > { %p2118_p5 = pnand %p2117_p4, %p2111_p3 }
  0x24   : > { %2121 = shalt.err (!%p2118_p5)
}
  0x25   : > { %s2222_s22 = smov 256   ;;  %s2223_s23 = smov 16  }
  0x26   : > { %1808 = dma.hbm_to_vmem [thread:$0]  (!%p2308_p7), %s2490_s1, 1024, %s219_s10, [#allocation6], %s2222_s22, %s2222_s22, %s2223_s23  }
  0x27   : > { %s2122_s12 = scalar_lea.hbm %s2492_s3, 16384 }
  0x28   : > { %p2123_p8 = scmp.ne.s32.totalorder %s2492_s3, %s2122_s12  ;;  %p2129_p5 = scmp.lt.u32.totalorder %s2122_s12, %s2492_s3 }
  0x2a   : > { %p2125_p1 = pnand %p2123_p8, %p2096_p9 }
  0x2c   : > { %p2126_p4 = pneg %p2125_p1 }
  0x2e   : > { %p2131_p10 = pnand %p2129_p5, %p2126_p4 }
  0x30   : > { %2134 = shalt.err (!%p2131_p10)
}
  0x31   : > { %s2135_s10 = scalar_lea.vmem %s2312_s13, 16384  ;;  %p2143_p0 = scmp.lt.s32.totalorder %s2312_s13, %s2312_s13 }
  0x32   : > { %p2136_p11 = scmp.ne.s32.totalorder %s2312_s13, %s2135_s10  ;;  %p2144_p2 = scmp.lt.s32.totalorder %s2135_s10, %s2135_s10 }
  0x34   : > { %p2138_p12 = pnand %p2136_p11, %p2096_p9  ;;  %p2145_p3 = por %p2144_p2, %p2143_p0 }
  0x36   : > { %p2139_p13 = pneg %p2138_p12 }
  0x38   : > { %p2146_p6 = pnand %p2145_p3, %p2139_p13 }
  0x3a   : > { %2149 = shalt.err (!%p2146_p6)
}
  0x3b   : > { %1811 = dma.hbm_to_vmem [thread:$0]  (!%p2308_p7), %s2492_s3, 16384, %s2312_s13, [#allocation6], %s2222_s22, %s2222_s22, %s2223_s23  }
  0x3c   : > { %s2362_s20 = sadd.s32 1, %s2218_s29   ;;  %s30_s21 = sadd.s32 1, %s2214_s28 }
  0x3d   : > { %s27_s11 = ssub.s32 %s2218_s29, %s2362_s20  ;;  %p37_p9 = scmp.ne.s32.totalorder %s2214_s28, %s2210_s27 }
  0x3e   : > { %p28_p8 = scmp.eq.s32.totalorder %s27_s11, 0  ;;  %p38_p1 = scmp.eq.s32.totalorder %s2218_s29, 0 }
  0x3f   : > { %p1818_p4 = scmp.lt.s32.totalorder %s2218_s29, 3  ;;  %s257_s24 = sand.u32 1, %s2214_s28  }
  0x40   : > { %s2373_s25 = scalar_select %p28_p8, %s2214_s28, %s30_s21  }
  0x41   : > { %p39_p5 = por %p38_p1, %p37_p9  ;;  %s1627_s26 = sshll.u32 %s257_s24, 2 }
  0x42   : > { %s1628_s9 = sshll.u32 %s2218_s29, 6  ;;  %s261_s13 = scalar_lea.vmem [#allocation3], %s1627_s26 }
  0x43   : > { %s2379_s15 = scalar_lea.hbm %s2489_s0, %s1628_s9  ;;  %s268_s22 = sshll.u32 %s261_s13, 4  ;;  %s2385_s22 = int_to_ptr.vmem [resolvable:$true] %s268_s22 }
  0x44   : > { %p2381_p7 = pnand %p1818_p4, %p39_p5  ;;  %s258_s29 = scalar_lea.sflag [#allocation4], %s257_s24 }
  0x45   : > { %s2150_s16 = scalar_lea.hbm %s2379_s15, 64  ;;  %s2155_s18 = scalar_lea.hbm %s2489_s0, 192 }
  0x46   : > { %p2151_p10 = scmp.ne.s32.totalorder %s2379_s15, %s2150_s16  ;;  %p2152_p11 = pneg %p2381_p7 }
  0x47   : > { %p2156_p0 = scmp.lt.u32.totalorder %s2379_s15, %s2489_s0  ;;  %p2157_p2 = scmp.lt.u32.totalorder %s2155_s18, %s2150_s16 }
  0x48   : > { %p2153_p12 = pnand %p2152_p11, %p2151_p10  ;;  %p2159_p6 = scmp.lt.u32.totalorder %s2150_s16, %s2379_s15 }
  0x49   : > { %p2158_p3 = por %p2157_p2, %p2156_p0 }
  0x4a   : > { %p2154_p13 = pneg %p2153_p12 }
  0x4b   : > { %p2160_p9 = por %p2159_p6, %p2158_p3 }
  0x4d   : > { %p2161_p8 = pnand %p2160_p9, %p2154_p13 }
  0x4f   : > { %2164 = shalt.err (!%p2161_p8)
}
  0x50   : > { %s2165_s11 = scalar_lea.vmem %s2385_s22, 64  ;;  %s2224_s24 = smov [#allocation3]  }
  0x51   : > { %p2166_p1 = scmp.ne.s32.totalorder %s2385_s22, %s2165_s11  ;;  %s2170_s26 = sshll.u32 %s2224_s24, 4  ;;  %s2171_s26 = int_to_ptr.vmem [resolvable:$false] %s2170_s26 }
  0x52   : > { %s2172_s9 = scalar_lea.vmem %s2171_s26, 128  ;;  %p2173_p10 = scmp.lt.s32.totalorder %s2385_s22, %s2171_s26 }
  0x53   : > { %p2168_p4 = pnand %p2166_p1, %p2152_p11  ;;  %p2174_p12 = scmp.lt.s32.totalorder %s2172_s9, %s2165_s11 }
  0x55   : > { %p2169_p5 = pneg %p2168_p4  ;;  %p2175_p0 = por %p2174_p12, %p2173_p10 }
  0x57   : > { %p2176_p2 = pnand %p2175_p0, %p2169_p5 }
  0x59   : > { %2179 = shalt.err (!%p2176_p2)
}
  0x5a   : > { %1815 = dma.hbm_to_vmem [thread:$0]  (!%p2381_p7), %s2379_s15, 64, %s2385_s22, %s258_s29  }
  0x5b   : > { %p2504_p13 = scmp.ne.s32.totalorder %s2501_s8, 0 }
  0x5c   : > { %s279_s12 = sand.u32 (!%p2504_p13), 1, %s2210_s27   ;;  %p2505_p11 = scmp.ne.s32.totalorder (!%p2504_p13), %s2500_s30, 0 }
  0x5d   : > { %277 = sbr.rel (%p2504_p13) target bundleno = 821 (0x335), region = 48  ;;  %s1630_s14 = sshll.u32 (!%p2504_p13), %s279_s12, 2 }
  0x5e   : > { %s280_s13 = scalar_lea.sflag (!%p2504_p13), [#allocation4], %s279_s12  ;;  %s283_s16 = scalar_lea.vmem (!%p2504_p13), [#allocation3], %s1630_s14 }
  0x64   : > { %2197 = dma.done.wait (%p2505_p11), %s280_s13, 64  }
  0x65   : > { %2199 = vsyncadd (%p2505_p11), %s280_s13, 4294967232  ;;  %p2506_p3 = scmp.eq.s32.totalorder %s2288_s6, 0 }
  0x67   : > { %2201 = dma.done.wait (%p2506_p3), [#allocation6], 17408   ;;  %p2507_p6 = pmov %p2506_p3 }
  0x68   : > { %v2225_v1 = vmov 0   ;;  %v1858_v2 = vld [vmem:[#allocation5 + $0x4] ss:$16 sps:$4 sm:$0xff]   ;;  %v1860_v3 = vld [vmem:[#allocation5] ss:$16 sps:$4 sm:$0xff]   ;;  %vm397_vm0 = vcmask 261120  }
  0x69   : > { %2203 = vsyncadd (%p2507_p6), [#allocation6], 4294949888  ;;  %433 = vmatprep.mubr.bf16.mxu0 %v2225_v1  ;;  %474 = vmatprep.mubr.bf16.mxu1 %v2225_v1  ;;  %v1861_v4 = vld [vmem:[#allocation5 + $0x24] ss:$16 sps:$4 sm:$0xff]   ;;  %v1863_v5 = vld [vmem:[#allocation5 + $0x20] ss:$16 sps:$4 sm:$0xff]  }
  0x6a   : > { %401 = vmatprep.subr.bf16.mxu0 %v1858_v2  ;;  %v1864_v6 = vld [vmem:[#allocation5 + $0xc] ss:$16 sps:$4 sm:$0xff]   ;;  %v1866_v7 = vld [vmem:[#allocation5 + $0x8] ss:$16 sps:$4 sm:$0xff]   ;;  %v1872_v11 = vld [vmem:[#allocation7 + $0x4] ss:$16 sps:$4 sm:$0xff]  }
  0x6b   : > { %402 = vmatpush1.bf16.msra.mxu0 %v1860_v3  ;;  %v326_v8 = vld [vmem:[%s283_s16] sm:$0xf]  ;;  %442 = vmatprep.subr.bf16.mxu1 %v1864_v6  ;;  %v1870_v12 = vld [vmem:[#allocation7] ss:$16 sps:$4 sm:$0xff]   ;;  %v1878_v14 = vld [vmem:[#allocation7 + $0x24] ss:$16 sps:$4 sm:$0xff]  }
  0x6c   : > { %403 = vmatprep.subr.bf16.mxu0 %v1861_v4  ;;  %v1867_v9 = vld [vmem:[#allocation5 + $0x2c] ss:$16 sps:$4 sm:$0xff]   ;;  %443 = vmatpush1.bf16.msra.mxu1 %v1866_v7  ;;  %v1869_v10 = vld [vmem:[#allocation5 + $0x28] ss:$16 sps:$4 sm:$0xff]   ;;  %v1876_v16 = vld [vmem:[#allocation7 + $0x20] ss:$16 sps:$4 sm:$0xff]  }
  0x6d   : > { %444 = vmatprep.subr.bf16.mxu1 %v1867_v9  ;;  %v1875_v13 = vld [vmem:[#allocation7 + $0xc] ss:$16 sps:$4 sm:$0xff]   ;;  %v1873_v15 = vld [vmem:[#allocation7 + $0x8] ss:$16 sps:$4 sm:$0xff]   ;;  %v1884_v18 = vld [vmem:[#allocation7 + $0x44] ss:$16 sps:$4 sm:$0xff]  }
  0x6e   : > { %v1881_v17 = vld [vmem:[#allocation7 + $0x2c] ss:$16 sps:$4 sm:$0xff]   ;;  %v1879_v19 = vld [vmem:[#allocation7 + $0x28] ss:$16 sps:$4 sm:$0xff]   ;;  %v1882_v20 = vld [vmem:[#allocation7 + $0x40] ss:$16 sps:$4 sm:$0xff]  }
  0x6f   : > { %404 = vmatpush1.bf16.msra.mxu0 %v1863_v5  ;;  %v1887_v21 = vld [vmem:[#allocation7 + $0x4c] ss:$16 sps:$4 sm:$0xff]   ;;  %v1890_v22 = vld [vmem:[#allocation7 + $0x64] ss:$16 sps:$4 sm:$0xff]   ;;  %v1885_v23 = vld [vmem:[#allocation7 + $0x48] ss:$16 sps:$4 sm:$0xff]  }
  0x70   : > { %1305 = vmatprep.subr.bf16.mxu0 %v1872_v11  ;;  %445 = vmatpush1.bf16.msra.mxu1 %v1869_v10  ;;  %v1888_v24 = vld [vmem:[#allocation7 + $0x60] ss:$16 sps:$4 sm:$0xff]   ;;  %v1893_v25 = vld [vmem:[#allocation7 + $0x6c] ss:$16 sps:$4 sm:$0xff]   ;;  %v1896_v26 = vld [vmem:[#allocation7 + $0x84] ss:$16 sps:$4 sm:$0xff]  }
  0x71   : > { %1387 = vmatprep.subr.bf16.mxu1 %v1875_v13  ;;  %v1891_v27 = vld [vmem:[#allocation7 + $0x68] ss:$16 sps:$4 sm:$0xff]   ;;  %v1894_v28 = vld [vmem:[#allocation7 + $0x80] ss:$16 sps:$4 sm:$0xff]   ;;  %v1899_v29 = vld [vmem:[#allocation7 + $0x8c] ss:$16 sps:$4 sm:$0xff]   ;;  %v337_v13 = vlaneseq }
  0x72   : > { %1642 = vmatmul.mubr.msk.bf16.vlgmr.msra.gmra.mrb[0].mxu0 %vm397_vm0, %v326_v8  ;;  %v1902_v30 = vld [vmem:[#allocation7 + $0xa4] ss:$16 sps:$4 sm:$0xff]   ;;  %v1897_v31 = vld [vmem:[#allocation7 + $0x88] ss:$16 sps:$4 sm:$0xff]   ;;  %v1900_v32 = vld [vmem:[#allocation7 + $0xa0] ss:$16 sps:$4 sm:$0xff]  }
  0x73   : > { %1306 = vmatpush1.bf16.msra.mxu0 %v1870_v12  ;;  %1643 = vmatmul.mubr.msk.bf16.vlgmr.msra.gmra.mrb[0].mxu1 %vm397_vm0, %v326_v8  ;;  %v1905_v33 = vld [vmem:[#allocation7 + $0xac] ss:$16 sps:$4 sm:$0xff]   ;;  %v1908_v34 = vld [vmem:[#allocation7 + $0xc4] ss:$16 sps:$4 sm:$0xff]   ;;  %v1903_v35 = vld [vmem:[#allocation7 + $0xa8] ss:$16 sps:$4 sm:$0xff]  }
  0x74   : > { %1307 = vmatprep.subr.bf16.mxu0 %v1878_v14  ;;  %1388 = vmatpush1.bf16.msra.mxu1 %v1873_v15  ;;  %v1906_v36 = vld [vmem:[#allocation7 + $0xc0] ss:$16 sps:$4 sm:$0xff]   ;;  %v1911_v37 = vld [vmem:[#allocation7 + $0xcc] ss:$16 sps:$4 sm:$0xff]   ;;  %v1914_v38 = vld [vmem:[#allocation7 + $0xe4] ss:$16 sps:$4 sm:$0xff]  }
  0x75   : > { %1389 = vmatprep.subr.bf16.mxu1 %v1881_v17  ;;  %v1909_v39 = vld [vmem:[#allocation7 + $0xc8] ss:$16 sps:$4 sm:$0xff]   ;;  %v1912_v40 = vld [vmem:[#allocation7 + $0xe0] ss:$16 sps:$4 sm:$0xff]   ;;  %v1917_v41 = vld [vmem:[#allocation7 + $0xec] ss:$16 sps:$4 sm:$0xff]  }
  0x76   : > { %v1915_v42 = vld [vmem:[#allocation7 + $0xe8] ss:$16 sps:$4 sm:$0xff]   ;;  %v1920_v43 = vld [vmem:[#allocation7 + $0x104] ss:$16 sps:$4 sm:$0xff]   ;;  %v1923_v44 = vld [vmem:[#allocation7 + $0x10c] ss:$16 sps:$4 sm:$0xff]  }
  0x77   : > { %1308 = vmatpush1.bf16.msra.mxu0 %v1876_v16  ;;  %v1918_v45 = vld [vmem:[#allocation7 + $0x100] ss:$16 sps:$4 sm:$0xff]   ;;  %v1921_v46 = vld [vmem:[#allocation7 + $0x108] ss:$16 sps:$4 sm:$0xff]   ;;  %v1926_v47 = vld [vmem:[#allocation7 + $0x124] ss:$16 sps:$4 sm:$0xff]  }
  0x78   : > { %1309 = vmatprep.subr.bf16.mxu0 %v1884_v18  ;;  %1390 = vmatpush1.bf16.msra.mxu1 %v1879_v19  ;;  %v1929_v48 = vld [vmem:[#allocation7 + $0x12c] ss:$16 sps:$4 sm:$0xff]   ;;  %v1924_v49 = vld [vmem:[#allocation7 + $0x120] ss:$16 sps:$4 sm:$0xff]   ;;  %v1927_v50 = vld [vmem:[#allocation7 + $0x128] ss:$16 sps:$4 sm:$0xff]  }
  0x79   : > { %1391 = vmatprep.subr.bf16.mxu1 %v1887_v21  ;;  %v1932_v51 = vld [vmem:[#allocation7 + $0x144] ss:$16 sps:$4 sm:$0xff]   ;;  %v1935_v52 = vld [vmem:[#allocation7 + $0x14c] ss:$16 sps:$4 sm:$0xff]   ;;  %v1930_v53 = vld [vmem:[#allocation7 + $0x140] ss:$16 sps:$4 sm:$0xff]  }
  0x7a   : > { %v1933_v54 = vld [vmem:[#allocation7 + $0x148] ss:$16 sps:$4 sm:$0xff]   ;;  %v1938_v55 = vld [vmem:[#allocation7 + $0x164] ss:$16 sps:$4 sm:$0xff]   ;;  %v1941_v56 = vld [vmem:[#allocation7 + $0x16c] ss:$16 sps:$4 sm:$0xff]  }
  0x7b   : > { %1310 = vmatpush1.bf16.msra.mxu0 %v1882_v20  ;;  %v1936_v57 = vld [vmem:[#allocation7 + $0x160] ss:$16 sps:$4 sm:$0xff]   ;;  %v1939_v58 = vld [vmem:[#allocation7 + $0x168] ss:$16 sps:$4 sm:$0xff]   ;;  %v1944_v59 = vld [vmem:[#allocation7 + $0x184] ss:$16 sps:$4 sm:$0xff]  }
  0x7c   : > { %1311 = vmatprep.subr.bf16.mxu0 %v1890_v22  ;;  %1392 = vmatpush1.bf16.msra.mxu1 %v1885_v23  ;;  %v1947_v60 = vld [vmem:[#allocation7 + $0x18c] ss:$16 sps:$4 sm:$0xff]   ;;  %v1942_v61 = vld [vmem:[#allocation7 + $0x180] ss:$16 sps:$4 sm:$0xff]   ;;  %v1945_v62 = vld [vmem:[#allocation7 + $0x188] ss:$16 sps:$4 sm:$0xff]  }
  0x7d   : > { %1393 = vmatprep.subr.bf16.mxu1 %v1893_v25  ;;  %v1950_v63 = vld [vmem:[#allocation7 + $0x1a4] ss:$16 sps:$4 sm:$0xff]   ;;  %v1953_v0 = vld [vmem:[#allocation7 + $0x1ac] ss:$16 sps:$4 sm:$0xff]   ;;  %v1948_v1 = vld [vmem:[#allocation7 + $0x1a0] ss:$16 sps:$4 sm:$0xff]  }
  0x7e   : > { %v1951_v2 = vld [vmem:[#allocation7 + $0x1a8] ss:$16 sps:$4 sm:$0xff]   ;;  %v1956_v3 = vld [vmem:[#allocation7 + $0x1c4] ss:$16 sps:$4 sm:$0xff]   ;;  %v1959_v4 = vld [vmem:[#allocation7 + $0x1cc] ss:$16 sps:$4 sm:$0xff]  }
  0x7f   : > { %1312 = vmatpush1.bf16.msra.mxu0 %v1888_v24  ;;  %v1954_v5 = vld [vmem:[#allocation7 + $0x1c0] ss:$16 sps:$4 sm:$0xff]   ;;  %v1957_v6 = vld [vmem:[#allocation7 + $0x1c8] ss:$16 sps:$4 sm:$0xff]   ;;  %v1962_v7 = vld [vmem:[#allocation7 + $0x1e4] ss:$16 sps:$4 sm:$0xff]  }
  0x80   : > { %1313 = vmatprep.subr.bf16.mxu0 %v1896_v26  ;;  %1394 = vmatpush1.bf16.msra.mxu1 %v1891_v27  ;;  %v1965_v8 = vld [vmem:[#allocation7 + $0x1ec] ss:$16 sps:$4 sm:$0xff]   ;;  %v1960_v9 = vld [vmem:[#allocation7 + $0x1e0] ss:$16 sps:$4 sm:$0xff]   ;;  %v1963_v10 = vld [vmem:[#allocation7 + $0x1e8] ss:$16 sps:$4 sm:$0xff]  }
  0x81   : > { %1395 = vmatprep.subr.bf16.mxu1 %v1899_v29  ;;  %v1968_v11 = vld [vmem:[#allocation7 + $0x204] ss:$16 sps:$4 sm:$0xff]   ;;  %v1971_v12 = vld [vmem:[#allocation7 + $0x20c] ss:$16 sps:$4 sm:$0xff]   ;;  %v2423_v14 = vshrl.u32 %v337_v13, 7  ;;  %p321_p7 = scmp.lt.s32.totalorder %s2288_s6, 2 }
  0x82   : > { %v2431_v16 = vld [vmem:[%s2491_s2] sm:$0xf]  ;;  %vm1536_vm1 = vcmask 7168  }
  0x83   : > { %1314 = vmatpush1.bf16.msra.mxu0 %v1894_v28  ;;  %v2426_v15 = vsub.s32 0, %v2423_v14  ;;  %v2434_v17 = vsub.s32 1, %v2423_v14  ;;  %v2439_v19 = vsub.s32 3, %v2423_v14  ;;  %s2513_s6 = smov (!%p321_p7, %s2288_s6), 2 }
  0x84   : > { %1315 = vmatprep.subr.bf16.mxu0 %v1902_v30  ;;  %1396 = vmatpush1.bf16.msra.mxu1 %v1897_v31  ;;  %s1633_s17 = sshll.u32 %s2513_s6, 3 }
  0x85   : > { %1397 = vmatprep.subr.bf16.mxu1 %v1905_v33  ;;  %v340_v18 = vrot.slane %v2431_v16, %v2426_v15  ;;  %v344_v20 = vrot.slane %v2431_v16, %v2434_v17  ;;  %v352_v24 = vrot.slane %v2431_v16, %v2439_v19  ;;  %s324_s19 = scalar_lea.vmem %s2496_s7, %s1633_s17 }
  0x87   : > { %1316 = vmatpush1.bf16.msra.mxu0 %v1900_v32 }
  0x88   : > { %1317 = vmatprep.subr.bf16.mxu0 %v1908_v34  ;;  %1398 = vmatpush1.bf16.msra.mxu1 %v1903_v35 }
  0x89   : > { %1399 = vmatprep.subr.bf16.mxu1 %v1911_v37 }
  0x8b   : > { %1318 = vmatpush1.bf16.msra.mxu0 %v1906_v36 }
  0x8c   : > { %1319 = vmatprep.subr.bf16.mxu0 %v1914_v38  ;;  %1400 = vmatpush1.bf16.msra.mxu1 %v1909_v39 }
  0x8d   : > { %1401 = vmatprep.subr.bf16.mxu1 %v1917_v41 }
  0x8f   : > { %1320 = vmatpush1.bf16.msra.mxu0 %v1912_v40 }
  0x90   : > { %1402 = vmatpush1.bf16.msra.mxu1 %v1915_v42  ;;  %1321 = vmatprep.subr.bf16.mxu0 %v1920_v43 }
  0x91   : > { %1403 = vmatprep.subr.bf16.mxu1 %v1923_v44 }
  0x93   : > { %1322 = vmatpush1.bf16.msra.mxu0 %v1918_v45 }
  0x94   : > { %1404 = vmatpush1.bf16.msra.mxu1 %v1921_v46  ;;  %1323 = vmatprep.subr.bf16.mxu0 %v1926_v47 }
  0x95   : > { %1405 = vmatprep.subr.bf16.mxu1 %v1929_v48  ;;  %v1966_v48 = vld [vmem:[#allocation7 + $0x200] ss:$16 sps:$4 sm:$0xff]  }
  0x97   : > { %1324 = vmatpush1.bf16.msra.mxu0 %v1924_v49  ;;  %v1969_v49 = vld [vmem:[#allocation7 + $0x208] ss:$16 sps:$4 sm:$0xff]  }
  0x98   : > { %1406 = vmatpush1.bf16.msra.mxu1 %v1927_v50  ;;  %1325 = vmatprep.subr.bf16.mxu0 %v1932_v51 }
  0x99   : > { %1407 = vmatprep.subr.bf16.mxu1 %v1935_v52  ;;  %v1974_v52 = vld [vmem:[#allocation7 + $0x224] ss:$16 sps:$4 sm:$0xff]  }
  0x9b   : > { %1326 = vmatpush1.bf16.msra.mxu0 %v1930_v53  ;;  %v1977_v53 = vld [vmem:[#allocation7 + $0x22c] ss:$16 sps:$4 sm:$0xff]  }
  0x9c   : > { %1408 = vmatpush1.bf16.msra.mxu1 %v1933_v54  ;;  %1327 = vmatprep.subr.bf16.mxu0 %v1938_v55  ;;  %v1972_v55 = vld [vmem:[#allocation7 + $0x220] ss:$16 sps:$4 sm:$0xff]  }
  0x9d   : > { %1409 = vmatprep.subr.bf16.mxu1 %v1941_v56  ;;  %v1975_v56 = vld [vmem:[#allocation7 + $0x228] ss:$16 sps:$4 sm:$0xff]  }
  0x9f   : > { %1328 = vmatpush1.bf16.msra.mxu0 %v1936_v57  ;;  %v1980_v57 = vld [vmem:[#allocation7 + $0x244] ss:$16 sps:$4 sm:$0xff]  }
  0xa0   : > { %1410 = vmatpush1.bf16.msra.mxu1 %v1939_v58  ;;  %1329 = vmatprep.subr.bf16.mxu0 %v1944_v59  ;;  %v1983_v58 = vld [vmem:[#allocation7 + $0x24c] ss:$16 sps:$4 sm:$0xff]   ;;  %v1978_v59 = vld [vmem:[#allocation7 + $0x240] ss:$16 sps:$4 sm:$0xff]  }
  0xa1   : > { %1411 = vmatprep.subr.bf16.mxu1 %v1947_v60  ;;  %v1981_v60 = vld [vmem:[#allocation7 + $0x248] ss:$16 sps:$4 sm:$0xff]  }
  0xa3   : > { %1330 = vmatpush1.bf16.msra.mxu0 %v1942_v61  ;;  %v1986_v61 = vld [vmem:[#allocation7 + $0x264] ss:$16 sps:$4 sm:$0xff]  }
  0xa4   : > { %1412 = vmatpush1.bf16.msra.mxu1 %v1945_v62  ;;  %1331 = vmatprep.subr.bf16.mxu0 %v1950_v63  ;;  %v1989_v62 = vld [vmem:[#allocation7 + $0x26c] ss:$16 sps:$4 sm:$0xff]   ;;  %v1984_v63 = vld [vmem:[#allocation7 + $0x260] ss:$16 sps:$4 sm:$0xff]  }
  0xa5   : > { %1413 = vmatprep.subr.bf16.mxu1 %v1953_v0  ;;  %v1987_v0 = vld [vmem:[#allocation7 + $0x268] ss:$16 sps:$4 sm:$0xff]  }
  0xa7   : > { %1332 = vmatpush1.bf16.msra.mxu0 %v1948_v1  ;;  %v1992_v1 = vld [vmem:[#allocation7 + $0x284] ss:$16 sps:$4 sm:$0xff]  }
  0xa8   : > { %1414 = vmatpush1.bf16.msra.mxu1 %v1951_v2  ;;  %1333 = vmatprep.subr.bf16.mxu0 %v1956_v3  ;;  %v1995_v2 = vld [vmem:[#allocation7 + $0x28c] ss:$16 sps:$4 sm:$0xff]   ;;  %v2448_v3 = vsub.s32 2, %v2423_v14  ;;  %v2002_v14 = vld [vmem:[#allocation7 + $0x2c0] ss:$16 sps:$4 sm:$0xff]  }
  0xa9   : > { %1415 = vmatprep.subr.bf16.mxu1 %v1959_v4  ;;  %v1990_v4 = vld [vmem:[#allocation7 + $0x280] ss:$16 sps:$4 sm:$0xff]  }
  0xab   : > { %1334 = vmatpush1.bf16.msra.mxu0 %v1954_v5  ;;  %v1993_v5 = vld [vmem:[#allocation7 + $0x288] ss:$16 sps:$4 sm:$0xff]  }
  0xac   : > { %1416 = vmatpush1.bf16.msra.mxu1 %v1957_v6  ;;  %1335 = vmatprep.subr.bf16.mxu0 %v1962_v7  ;;  %v1998_v6 = vld [vmem:[#allocation7 + $0x2a4] ss:$16 sps:$4 sm:$0xff]   ;;  %v2001_v7 = vld [vmem:[#allocation7 + $0x2ac] ss:$16 sps:$4 sm:$0xff]  }
  0xad   : > { %1417 = vmatprep.subr.bf16.mxu1 %v1965_v8  ;;  %v348_v8 = vrot.slane %v2431_v16, %v2448_v3 }
  0xaf   : > { %1336 = vmatpush1.bf16.msra.mxu0 %v1960_v9  ;;  %v1996_v9 = vld [vmem:[#allocation7 + $0x2a0] ss:$16 sps:$4 sm:$0xff]  }
  0xb0   : > { %1418 = vmatpush1.bf16.msra.mxu1 %v1963_v10  ;;  %1346 = vmatprep.subr.bf16.mxu0 %v1968_v11  ;;  %v1999_v10 = vld [vmem:[#allocation7 + $0x2a8] ss:$16 sps:$4 sm:$0xff]   ;;  %v2004_v11 = vld [vmem:[#allocation7 + $0x2c4] ss:$16 sps:$4 sm:$0xff]  }
  0xb1   : > { %1428 = vmatprep.subr.bf16.mxu1 %v1971_v12  ;;  %v2007_v12 = vld [vmem:[#allocation7 + $0x2cc] ss:$16 sps:$4 sm:$0xff]  }
 0x145   : > { %v435_v21 = vpop.f32.mrb[0].mxu0 }
 0x146   : > { %v436_v22 = vadd.f32 %v435_v21, %v340_v18  ;;  %v437_v23 = vpop.f32.mrb[1].mxu0  ;;  %v2445_v29 = vpop.f32.mrb[0].mxu1  ;;  %v2005_v18 = vld [vmem:[#allocation7 + $0x2c8] ss:$16 sps:$4 sm:$0xff]   ;;  %v2013_v21 = vld [vmem:[#allocation7 + $0x2ec] ss:$16 sps:$4 sm:$0xff]  }
 0x147   : > { %v438_v25 = vadd.f32 %v437_v23, %v344_v20  ;;  %v439_v26 = vpop.f32.mrb[2].mxu0  ;;  %v478_v31 = vpop.f32.mrb[1].mxu1  ;;  %v2453_v13 = vadd.f32 %v2445_v29, %v348_v8  ;;  %v2010_v20 = vld [vmem:[#allocation7 + $0x2e4] ss:$16 sps:$4 sm:$0xff]   ;;  %v2011_v23 = vld [vmem:[#allocation7 + $0x2e8] ss:$16 sps:$4 sm:$0xff]  }
 0x148   : > { %v1644_v27 = vmul.f32 -1.442695, %v436_v22  ;;  %v440_v28 = vpop.f32.mrb[3].mxu0  ;;  %v479_v32 = vadd.f32 %v478_v31, %v352_v24  ;;  %v480_v33 = vpop.f32.mrb[2].mxu1  ;;  %v2016_v24 = vld [vmem:[#allocation7 + $0x304] ss:$16 sps:$4 sm:$0xff]  }
 0x149   : > { %v1645_v30 = vmul.f32 -1.442695, %v438_v25  ;;  %v481_v34 = vpop.f32.mrb[3].mxu1  ;;  %v1646_v16 = vmul.f32 -1.442695, %v2453_v13 }
 0x14a   : > { %2062 = vpow2.f32 %v1644_v27  ;;  %v1647_v35 = vmul.f32 -1.442695, %v479_v32  ;;  %v2014_v26 = vld [vmem:[#allocation7 + $0x300] ss:$16 sps:$4 sm:$0xff]   ;;  %v2017_v27 = vld [vmem:[#allocation7 + $0x308] ss:$16 sps:$4 sm:$0xff]  }
 0x14b   : > { %2064 = vpow2.f32 %v1645_v30  ;;  %v2022_v28 = vld [vmem:[#allocation7 + $0x324] ss:$16 sps:$4 sm:$0xff]   ;;  %v2025_v29 = vld [vmem:[#allocation7 + $0x32c] ss:$16 sps:$4 sm:$0xff]   ;;  %v2020_v30 = vld [vmem:[#allocation7 + $0x320] ss:$16 sps:$4 sm:$0xff]  }
 0x14c   : > { %2066 = vpow2.f32 %v1647_v35  ;;  %v2023_v31 = vld [vmem:[#allocation7 + $0x328] ss:$16 sps:$4 sm:$0xff]   ;;  %v2031_v33 = vld [vmem:[#allocation7 + $0x34c] ss:$16 sps:$4 sm:$0xff]   ;;  %v2026_v34 = vld [vmem:[#allocation7 + $0x340] ss:$16 sps:$4 sm:$0xff]  }
 0x14d   : > { %v2029_v35 = vld [vmem:[#allocation7 + $0x348] ss:$16 sps:$4 sm:$0xff]  }
 0x154   : > { %v2063_v36 = vpop.eup %2062 }
 0x155   : > { %v2065_v37 = vpop.eup %2064  ;;  %v495_v38 = vadd.f32 1.0, %v2063_v36 }
 0x156   : > { %v496_v39 = vadd.f32 1.0, %v2065_v37  ;;  %v2067_v40 = vpop.eup %2066  ;;  %v2034_v37 = vld [vmem:[#allocation7 + $0x364] ss:$16 sps:$4 sm:$0xff]  }
 0x157   : > { %2068 = vrcp.f32 %v495_v38  ;;  %v498_v41 = vadd.f32 1.0, %v2067_v40  ;;  %v2037_v38 = vld [vmem:[#allocation7 + $0x36c] ss:$16 sps:$4 sm:$0xff]   ;;  %v2032_v40 = vld [vmem:[#allocation7 + $0x360] ss:$16 sps:$4 sm:$0xff]  }
 0x158   : > { %2070 = vrcp.f32 %v496_v39 }
 0x159   : > { %2072 = vrcp.f32 %v498_v41  ;;  %v2035_v41 = vld [vmem:[#allocation7 + $0x368] ss:$16 sps:$4 sm:$0xff]  }
 0x15a   : > { %2074 = vpow2.f32 %v1646_v16 }
 0x161   : > { %v2069_v42 = vpop.eup %2068 }
 0x162   : > { %v2071_v43 = vpop.eup %2070  ;;  %v507_v44 = vmul.f32 %v2069_v42, %v436_v22  ;;  %v2008_v22 = vld [vmem:[#allocation7 + $0x2e0] ss:$16 sps:$4 sm:$0xff]   ;;  %v2040_v42 = vld [vmem:[#allocation7 + $0x384] ss:$16 sps:$4 sm:$0xff]  }
 0x163   : > { %v508_v45 = vmul.f32 %v2071_v43, %v438_v25  ;;  %v2073_v46 = vpop.eup %2072  ;;  %v2019_v25 = vld [vmem:[#allocation7 + $0x30c] ss:$16 sps:$4 sm:$0xff]  }
 0x164   : > { %v511_v50 = vpack.c.bf16 %v507_v44, %v507_v44  ;;  %v510_v51 = vmul.f32 %v2073_v46, %v479_v32  ;;  %v2028_v32 = vld [vmem:[#allocation7 + $0x344] ss:$16 sps:$4 sm:$0xff]   ;;  %v2075_v36 = vpop.eup %2074  ;;  %v2043_v43 = vld [vmem:[#allocation7 + $0x38c] ss:$16 sps:$4 sm:$0xff]   ;;  %v2038_v44 = vld [vmem:[#allocation7 + $0x380] ss:$16 sps:$4 sm:$0xff]  }
 0x165   : > { %v512_v47 = vpack.c.bf16 %v508_v45, %v508_v45  ;;  %v497_v39 = vadd.f32 1.0, %v2075_v36  ;;  %v2041_v45 = vld [vmem:[#allocation7 + $0x388] ss:$16 sps:$4 sm:$0xff]   ;;  %v2046_v46 = vld [vmem:[#allocation7 + $0x3a4] ss:$16 sps:$4 sm:$0xff]  }
 0x166   : > { %v514_v54 = vpack.c.bf16 %v510_v51, %v510_v51  ;;  %v2055_v51 = vld [vmem:[#allocation7 + $0x3cc] ss:$16 sps:$4 sm:$0xff]  }
 0x167   : > { %1337 = vmatprep.mubr.bf16.mxu0 %v512_v47  ;;  %1419 = vmatprep.mubr.bf16.mxu1 %v512_v47  ;;  %2076 = vrcp.f32 %v497_v39  ;;  %v2049_v47 = vld [vmem:[#allocation7 + $0x3ac] ss:$16 sps:$4 sm:$0xff]  }
 0x168   : > { %1338 = vmatmul.mubr.bf16.vlgmr.msra.gmra.mrb[4].mxu0 %v511_v50  ;;  %1420 = vmatmul.mubr.bf16.vlgmr.msra.gmra.mrb[4].mxu1 %v511_v50  ;;  %v2052_v50 = vld [vmem:[#allocation7 + $0x3c4] ss:$16 sps:$4 sm:$0xff]  }
 0x169   : > { %1347 = vmatpush1.bf16.msra.mxu0 %v1966_v48  ;;  %1429 = vmatpush1.bf16.msra.mxu1 %v1969_v49  ;;  %v2044_v48 = vld [vmem:[#allocation7 + $0x3a0] ss:$16 sps:$4 sm:$0xff]   ;;  %v2047_v49 = vld [vmem:[#allocation7 + $0x3a8] ss:$16 sps:$4 sm:$0xff]  }
 0x16a   : > { %1348 = vmatprep.subr.bf16.mxu0 %v1974_v52  ;;  %1430 = vmatprep.subr.bf16.mxu1 %v1977_v53  ;;  %v2050_v52 = vld [vmem:[#allocation7 + $0x3c0] ss:$16 sps:$4 sm:$0xff]   ;;  %v2053_v53 = vld [vmem:[#allocation7 + $0x3c8] ss:$16 sps:$4 sm:$0xff]  }
 0x16b   : > { %1378 = vmatprep.mubr.bf16.mxu0 %v514_v54  ;;  %1460 = vmatprep.mubr.bf16.mxu1 %v514_v54  ;;  %v2058_v54 = vld [vmem:[#allocation7 + $0x3e4] ss:$16 sps:$4 sm:$0xff]  }
 0x16d   : > { %1349 = vmatpush1.bf16.msra.mxu0 %v1972_v55  ;;  %1431 = vmatpush1.bf16.msra.mxu1 %v1975_v56  ;;  %v2061_v55 = vld [vmem:[#allocation7 + $0x3ec] ss:$16 sps:$4 sm:$0xff]  }
 0x16e   : > { %1350 = vmatprep.subr.bf16.mxu0 %v1980_v57  ;;  %1432 = vmatprep.subr.bf16.mxu1 %v1983_v58  ;;  %v2056_v57 = vld [vmem:[#allocation7 + $0x3e0] ss:$16 sps:$4 sm:$0xff]   ;;  %v2059_v58 = vld [vmem:[#allocation7 + $0x3e8] ss:$16 sps:$4 sm:$0xff]  }
 0x171   : > { %1351 = vmatpush1.bf16.msra.mxu0 %v1978_v59  ;;  %1433 = vmatpush1.bf16.msra.mxu1 %v1981_v60  ;;  %v2077_v56 = vpop.eup %2076 }
 0x172   : > { %1352 = vmatprep.subr.bf16.mxu0 %v1986_v61  ;;  %1434 = vmatprep.subr.bf16.mxu1 %v1989_v62  ;;  %v509_v59 = vmul.f32 %v2077_v56, %v2453_v13  ;;  %v643_v61 = vld [vmem:[%s2493_s4] sm:$0xf] }
 0x173   : > { %v648_v62 = vrot.slane %v643_v61, %v2426_v15 }
 0x174   : > { %v513_v60 = vpack.c.bf16 %v509_v59, %v509_v59 }
 0x175   : > { %1353 = vmatpush1.bf16.msra.mxu0 %v1984_v63  ;;  %1435 = vmatpush1.bf16.msra.mxu1 %v1987_v0  ;;  %v656_v63 = vrot.slane %v643_v61, %v2448_v3  ;;  %v652_v0 = vrot.slane %v643_v61, %v2434_v17 }
 0x176   : > { %1354 = vmatprep.subr.bf16.mxu0 %v1992_v1  ;;  %1436 = vmatprep.subr.bf16.mxu1 %v1995_v2  ;;  %v660_v1 = vrot.slane %v643_v61, %v2439_v19 }
 0x179   : > { %1355 = vmatpush1.bf16.msra.mxu0 %v1990_v4  ;;  %1437 = vmatpush1.bf16.msra.mxu1 %v1993_v5 }
 0x17a   : > { %1356 = vmatprep.subr.bf16.mxu0 %v1998_v6  ;;  %1438 = vmatprep.subr.bf16.mxu1 %v2001_v7 }
 0x17d   : > { %1357 = vmatpush1.bf16.msra.mxu0 %v1996_v9  ;;  %1439 = vmatpush1.bf16.msra.mxu1 %v1999_v10 }
 0x17e   : > { %1358 = vmatprep.subr.bf16.mxu0 %v2004_v11  ;;  %1440 = vmatprep.subr.bf16.mxu1 %v2007_v12 }
 0x181   : > { %1359 = vmatpush1.bf16.msra.mxu0 %v2002_v14  ;;  %1441 = vmatpush1.bf16.msra.mxu1 %v2005_v18 }
 0x182   : > { %1360 = vmatprep.subr.bf16.mxu0 %v2010_v20  ;;  %1442 = vmatprep.subr.bf16.mxu1 %v2013_v21 }
 0x185   : > { %1361 = vmatpush1.bf16.msra.mxu0 %v2008_v22  ;;  %1443 = vmatpush1.bf16.msra.mxu1 %v2011_v23 }
 0x186   : > { %1362 = vmatprep.subr.bf16.mxu0 %v2016_v24  ;;  %1444 = vmatprep.subr.bf16.mxu1 %v2019_v25 }
 0x189   : > { %1363 = vmatpush1.bf16.msra.mxu0 %v2014_v26  ;;  %1445 = vmatpush1.bf16.msra.mxu1 %v2017_v27 }
 0x18a   : > { %1364 = vmatprep.subr.bf16.mxu0 %v2022_v28  ;;  %1446 = vmatprep.subr.bf16.mxu1 %v2025_v29 }
 0x18d   : > { %1365 = vmatpush1.bf16.msra.mxu0 %v2020_v30  ;;  %1447 = vmatpush1.bf16.msra.mxu1 %v2023_v31  ;;  %v1497_v30 = vld [vmem:[%s2494_s5] sm:$0xf] }
 0x18e   : > { %1366 = vmatprep.subr.bf16.mxu0 %v2028_v32  ;;  %1448 = vmatprep.subr.bf16.mxu1 %v2031_v33  ;;  %v1502_v31 = vrot.slane %v1497_v30, %v2426_v15 }
 0x191   : > { %1367 = vmatpush1.bf16.msra.mxu0 %v2026_v34  ;;  %1449 = vmatpush1.bf16.msra.mxu1 %v2029_v35  ;;  %v1506_v35 = vrot.slane %v1497_v30, %v2434_v17  ;;  %v1780_v17 = vld [vmem:[#allocation2] ss:$0 sm:$0xff] }
 0x192   : > { %1368 = vmatprep.subr.bf16.mxu0 %v2034_v37  ;;  %1450 = vmatprep.subr.bf16.mxu1 %v2037_v38 }
 0x195   : > { %1369 = vmatpush1.bf16.msra.mxu0 %v2032_v40  ;;  %1451 = vmatpush1.bf16.msra.mxu1 %v2035_v41  ;;  %v1510_v41 = vrot.slane %v1497_v30, %v2448_v3 }
 0x196   : > { %1370 = vmatprep.subr.bf16.mxu0 %v2040_v42  ;;  %1452 = vmatprep.subr.bf16.mxu1 %v2043_v43 }
 0x199   : > { %1371 = vmatpush1.bf16.msra.mxu0 %v2038_v44  ;;  %1453 = vmatpush1.bf16.msra.mxu1 %v2041_v45  ;;  %v1514_v44 = vrot.slane %v1497_v30, %v2439_v19 }
 0x19a   : > { %1372 = vmatprep.subr.bf16.mxu0 %v2046_v46  ;;  %1454 = vmatprep.subr.bf16.mxu1 %v2049_v47 }
 0x19d   : > { %1373 = vmatpush1.bf16.msra.mxu0 %v2044_v48  ;;  %1455 = vmatpush1.bf16.msra.mxu1 %v2047_v49 }
 0x19e   : > { %1374 = vmatprep.subr.bf16.mxu0 %v2052_v50  ;;  %1456 = vmatprep.subr.bf16.mxu1 %v2055_v51 }
 0x1a1   : > { %1375 = vmatpush1.bf16.msra.mxu0 %v2050_v52  ;;  %1457 = vmatpush1.bf16.msra.mxu1 %v2053_v53 }
 0x1a2   : > { %1376 = vmatprep.subr.bf16.mxu0 %v2058_v54  ;;  %1458 = vmatprep.subr.bf16.mxu1 %v2061_v55 }
 0x1a5   : > { %1377 = vmatpush1.bf16.msra.mxu0 %v2056_v57  ;;  %1459 = vmatpush1.bf16.msra.mxu1 %v2059_v58 }
 0x1a8   : > { %1379 = vmatmul.mubr.bf16.vlgmr.msra.gmra.mrb[4].mxu0 %v513_v60  ;;  %1461 = vmatmul.mubr.bf16.vlgmr.msra.gmra.mrb[4].mxu1 %v513_v60 }
 0x27b   : > { %v1380_v2 = vpop.f32.mrb[4].mxu0  ;;  %v1462_v4 = vpop.f32.mrb[4].mxu1 }
 0x27c   : > { %v1783_v5 = vadd.f32 %v1380_v2, %v648_v62  ;;  %v1785_v6 = vadd.f32 %v1462_v4, %v656_v63  ;;  %v1382_v7 = vpop.f32.mrb[5].mxu0  ;;  %v1464_v8 = vpop.f32.mrb[5].mxu1 }
 0x27d   : > { %v1784_v9 = vadd.f32 %v1382_v7, %v652_v0  ;;  %v1786_v10 = vadd.f32 %v1464_v8, %v660_v1  ;;  %v1384_v11 = vpop.f32.mrb[6].mxu0  ;;  %v1466_v12 = vpop.f32.mrb[6].mxu1 }
 0x27e   : > { %v1776_v13 = vmul.f32 -1.442695, %v1783_v5  ;;  %v1778_v14 = vmul.f32 -1.442695, %v1785_v6  ;;  %v1385_v18 = vpop.f32.mrb[7].mxu0  ;;  %v1467_v20 = vpop.f32.mrb[7].mxu1 }
 0x27f   : > { %v1777_v21 = vmul.f32 -1.442695, %v1784_v9  ;;  %v1779_v16 = vmul.f32 -1.442695, %v1786_v10 }
 0x280   : > { %2078 = vpow2.f32 %v1776_v13 }
 0x281   : > { %2080 = vpow2.f32 %v1778_v14 }
 0x282   : > { %2082 = vpow2.f32 %v1777_v21 }
 0x283   : > { %2084 = vpow2.f32 %v1779_v16 }
 0x28a   : > { %v2079_v22 = vpop.eup %2078 }
 0x28b   : > { %v2081_v23 = vpop.eup %2080  ;;  %v1481_v24 = vadd.f32 1.0, %v2079_v22 }
 0x28c   : > { %v2083_v25 = vpop.eup %2082  ;;  %v1483_v26 = vadd.f32 1.0, %v2081_v23 }
 0x28d   : > { %v2085_v27 = vpop.eup %2084  ;;  %2086 = vrcp.f32 %v1481_v24  ;;  %v1482_v28 = vadd.f32 1.0, %v2083_v25 }
 0x28e   : > { %2088 = vrcp.f32 %v1483_v26  ;;  %v1484_v29 = vadd.f32 1.0, %v2085_v27 }
 0x28f   : > { %2090 = vrcp.f32 %v1482_v28 }
 0x290   : > { %2092 = vrcp.f32 %v1484_v29 }
 0x297   : > { %v2087_v32 = vpop.eup %2086 }
 0x298   : > { %v2089_v33 = vpop.eup %2088  ;;  %v1493_v34 = vmul.f32 %v2087_v32, %v1783_v5 }
 0x299   : > { %v2091_v36 = vpop.eup %2090  ;;  %v1495_v39 = vmul.f32 %v2089_v33, %v1785_v6 }
 0x29a   : > { %v2093_v37 = vpop.eup %2092  ;;  %v1519_v38 = vmul.f32 %v1502_v31, %v1493_v34  ;;  %v1494_v40 = vmul.f32 %v2091_v36, %v1784_v9 }
 0x29b   : > { %v1496_v43 = vmul.f32 %v2093_v37, %v1786_v10  ;;  %v1521_v45 = vmul.f32 %v1510_v41, %v1495_v39 }
 0x29c   : > { %v1520_v42 = vmul.f32 %v1506_v35, %v1494_v40 }
 0x29d   : > { %v1522_v46 = vmul.f32 %v1514_v44, %v1496_v43 }
 0x29e   : > { %v1523_v15 = vadd.f32 %v1520_v42, %v1519_v38 }
 0x2a0   : > { %v1524_v47 = vadd.f32 %v1523_v15, %v1521_v45 }
 0x2a2   : > { %v1525_v48 = vadd.f32 %v1524_v47, %v1522_v46 }
 0x2a4   : > { %1526 = vadd.xlane.f32.xlu0 %v1525_v48 }
 0x331   : > { %v1527_v49 = vpop.xlane.xlu0 %1526 }
 0x332   : > { %v1535_v3 = vadd.f32 %v1780_v17, %v1527_v49 }
 0x334   : > { %1537 = vst.msk [vmem:[%s324_s19] sm:$0xff] %vm1536_vm1, %v1535_v3 }
 0x335 PF: > { %p20_p9 = scmp.ge.s32.totalorder %s2362_s20, 5   ;;  %s2508_s26 = smov %s2210_s27 }
 0x336   : > { %s2509_s27 = smov %s2214_s28  ;;  %s2510_s28 = smov %s2373_s25 }
 0x337   : > { %s2511_s29 = smov %s2362_s20  ;;  %22 = sbr.rel (!%p20_p9) target bundleno = 7 (0x7), region = 96 }
 0x33e   :  { %1557 = vsyncpa [#allocation4], 1 }
 0x33f   :  { %1559 = vsyncpa [#allocation4 + $0x1], 1 }
 0x340   :  { %1560 = vsyncpa [#allocation6], 1 }

</bundles_post_ra>
